<compile_context>
chip_gen: v5e
topology: v5e:2x2
jax: 0.10.0
libtpu: 0.0.40
codegen_flags: <defaults>
</compile_context>

<pallas_src>
import math

import jax
import jax.numpy as jnp
from jax.experimental import pallas as pl
from jax.experimental.pallas import tpu as pltpu


def _pe_add_kernel(x_ref, pe_ref, o_ref):
    # x_ref : (TB, TC) tile of the (B, S*D)-flattened input
    # pe_ref: (1,  TC) tile of the (1, S*D)-flattened PE table
    o_ref[...] = x_ref[...] + pe_ref[...]  # broadcast add over the batch rows


def make_positional_encoding_table(d_model: int, seq_len: int) -> jnp.ndarray:
    """Reproduces the PyTorch buffer `pe` of shape (1, seq_len, d_model)."""
    position = jnp.arange(0, seq_len, dtype=jnp.float32)[:, None]            # (S, 1)
    div_term = jnp.exp(
        jnp.arange(0, d_model, 2, dtype=jnp.float32)
        * -(math.log(10000.0) / d_model)
    )                                                                        # (ceil(D/2),)
    angles = position * div_term                                             # (S, ceil(D/2))
    pe = jnp.zeros((seq_len, d_model), dtype=jnp.float32)
    pe = pe.at[:, 0::2].set(jnp.sin(angles))
    # Truncate cos columns so odd d_model also works (PyTorch original errors there).
    pe = pe.at[:, 1::2].set(jnp.cos(angles)[:, : d_model // 2])
    return pe[None, :, :]                                                    # (1, S, D)


def _pick_tiles(b, cols, itemsize, target_block_bytes):
    # Row (batch) tile: full extent if small, otherwise a multiple of 8, <= 256 rows.
    if b <= 8:
        tb = b
    else:
        tb = 8 * min(b // 8, 32)
    # Column tile: lane-dense multiple of 128 (full extent if cols <= 128),
    # sized so one x block is roughly target_block_bytes.
    if cols <= 128:
        tc = cols
    else:
        budget = max(128, target_block_bytes // (tb * itemsize))
        tc = min((cols // 128) * 128, (budget // 128) * 128)
        tc = max(tc, 128)
    n_row = -(-b // tb)
    n_col = -(-cols // tc)
    # Expose >= 2 parallel grid steps so both v7x TensorCores stream.
    if n_row * n_col == 1 and cols >= 256:
        tc = max(128, ((cols // 2) // 128) * 128)
        n_col = -(-cols // tc)
    return tb, tc, n_row, n_col


def positional_encoding_forward(
    x: jnp.ndarray,
    pe: jnp.ndarray,
    *,
    target_block_bytes: int = 2 * 1024 * 1024,
    in_place: bool = False,
) -> jnp.ndarray:
    """x: (B, S, D); pe: (1, seq_len, D) with seq_len >= S.  Returns x + pe[:, :S, :]."""
    b, s, d = x.shape
    _, seq_len, d_pe = pe.shape
    assert d == d_pe and s <= seq_len

    # Keep the add in the input dtype (v5e has no bf16 VALU; also halves HBM
    # bytes for bf16 pipelines).
    pe = pe.astype(x.dtype)
    if s != seq_len:
        pe = pe[:, :s, :]  # only materialize a slice when actually needed

    cols = s * d
    itemsize = jnp.dtype(x.dtype).itemsize
    x2 = x.reshape(b, cols)    # lane-dense 2D view (row-major reshape: no data movement)
    pe2 = pe.reshape(1, cols)

    tb, tc, n_row, n_col = _pick_tiles(b, cols, itemsize, target_block_bytes)

    # Grid: column tiles outer (slowly varying), batch tiles inner (fast), so
    # the PE block index is constant across the inner loop and stays resident.
    grid = (n_col, n_row)

    extra_kwargs = {}
    if in_place:
        # Do the add in place on x's HBM buffer (caller must treat x as donated).
        extra_kwargs["input_output_aliases"] = {0: 0}

    out2 = pl.pallas_call(
        _pe_add_kernel,
        out_shape=jax.ShapeDtypeStruct((b, cols), x.dtype),
        grid=grid,
        in_specs=[
            pl.BlockSpec((tb, tc), lambda j, i: (i, j)),   # x tile
            pl.BlockSpec((1, tc), lambda j, i: (0, j)),    # pe tile (batch-broadcast)
        ],
        out_specs=pl.BlockSpec((tb, tc), lambda j, i: (i, j)),
        compiler_params=pltpu.CompilerParams(
            dimension_semantics=("parallel", "parallel"),
        ),
        cost_estimate=pl.CostEstimate(
            flops=b * s * d,
            transcendentals=0,
            bytes_accessed=2 * b * s * d * itemsize + s * d * itemsize,
        ),
        **extra_kwargs,
    )(x2, pe2)

    # Dropout in eval mode is the identity.
    return out2.reshape(b, s, d)


if __name__ == "__main__":
    d_model = 32
    seq_len = 8
    batch = 2
    dropout_p = 0.1  # unused in eval mode

    key = jax.random.PRNGKey(0)
    x = jax.random.normal(key, (batch, seq_len, d_model), dtype=jnp.float32)

    pe = make_positional_encoding_table(d_model, seq_len)

    y = positional_encoding_forward(x, pe)
    y = jax.block_until_ready(y)

    # Sanity check against pure-JAX reference.
    ref = x + pe[:, :seq_len, :]
    assert y.shape == (batch, seq_len, d_model)
    assert jnp.allclose(y, ref, atol=1e-6), "mismatch vs reference"

    print("KERNEL_OK")
</pallas_src>

<mosaic_0001>
module attributes {stable_mosaic.version = 11 : i64} {
  func.func @_pe_add_kernel(%arg0: i32, %arg1: i32, %arg2: memref<2x128xf32, #tpu.memory_space<vmem>>, %arg3: memref<1x128xf32, #tpu.memory_space<vmem>>, %arg4: memref<2x128xf32, #tpu.memory_space<vmem>>) attributes {dimension_semantics = [#tpu.dimension_semantics<parallel>, #tpu.dimension_semantics<parallel>], iteration_bounds = array<i64: 2, 1>, scalar_prefetch = 0 : i64, scratch_operands = 0 : i64, tpu.core_type = #tpu.core_type<tc>, window_params = [{transform_indices = @transform_0, window_bounds = array<i64: 2, 128>}, {transform_indices = @transform_1, window_bounds = array<i64: 1, 128>}, {transform_indices = @transform_2, window_bounds = array<i64: 2, 128>}]} {
    %c0 = arith.constant 0 : index
    %c0_0 = arith.constant 0 : index
    %0 = vector.load %arg2[%c0, %c0_0] : memref<2x128xf32, #tpu.memory_space<vmem>>, vector<2x128xf32>
    %c0_1 = arith.constant 0 : index
    %c0_2 = arith.constant 0 : index
    %1 = vector.load %arg3[%c0_1, %c0_2] : memref<1x128xf32, #tpu.memory_space<vmem>>, vector<1x128xf32>
    %2 = vector.broadcast %1 : vector<1x128xf32> to vector<2x128xf32>
    %3 = arith.addf %0, %2 : vector<2x128xf32>
    %c0_3 = arith.constant 0 : index
    %c0_4 = arith.constant 0 : index
    %4 = vector.load %arg4[%c0_3, %c0_4] : memref<2x128xf32, #tpu.memory_space<vmem>>, vector<2x128xf32>
    tpu.vector_store %arg4[%c0_3, %c0_4], %3 {strides = array<i32>} : memref<2x128xf32, #tpu.memory_space<vmem>>, vector<2x128xf32>,
    return
  }
  func.func @transform_0(%arg0: i32, %arg1: i32) -> (i32, i32) {
    %c0_i32 = arith.constant 0 : i32
    return %arg1, %arg0 : i32, i32
  }
  func.func @transform_1(%arg0: i32, %arg1: i32) -> (i32, i32) {
    %c0_i32 = arith.constant 0 : i32
    %c0_i32_0 = arith.constant 0 : i32
    return %c0_i32, %arg0 : i32, i32
  }
  func.func @transform_2(%arg0: i32, %arg1: i32) -> (i32, i32) {
    %c0_i32 = arith.constant 0 : i32
    return %arg1, %arg0 : i32, i32
  }
}

</mosaic_0001>

<bundles_post_ra>
// kernel: tpu_custom_call.1
= control target key start
LH: loop header
LB: loop body
LE: loop exit
PB: predicated region body
PF: predicated region fallthrough
CT: control target
= control target key end

     0   :  { %7 = vsyncpa [#allocation3], 0  ;;  %s714_s0 = inlined_call_operand.hbm [shape: f32[2,256], index: 0, kind: input, shape index: {}]   ;;  %s715_s1 = inlined_call_operand.hbm [shape: f32[1,256], index: 1, kind: input, shape index: {}]   ;;  %s716_s2 = inlined_call_operand.hbm [shape: f32[2,256], index: 2, kind: output, shape index: {}]  }
   0x1   :  { %9 = vsyncpa [#allocation3 + $0x1], 0 }
   0x2   :  { %10 = vsyncpa [#allocation6], 0 }
   0x3   :  { %12 = vsyncpa [#allocation6 + $0x1], 0 }
   0x4   :  { %13 = vsyncpa [#allocation4], 0 }
   0x5   :  { %15 = vsyncpa [#allocation4 + $0x1], 0  ;;  %s584_s9 = smov 0   ;;  %s586_s10 = smov 0  }
   0x6   :  { %s588_s11 = smov 0   ;;  %s590_s12 = smov 0  }
   0x7   :  { %s592_s13 = smov 0   ;;  %s594_s14 = smov 0  }
   0x8 LB: > { %s340_s15 = sadd.s32 4294967295, %s567_s14   ;;  %s341_s16 = sadd.s32 4294967294, %s567_s14   ;;  %s567_s14 = sphi %s594_s14, %s21_s14   ;;  %s563_s13 = sphi %s592_s13, %s725_s13   ;;  %s559_s12 = sphi %s590_s12, %s724_s12   ;;  %s555_s11 = sphi %s588_s11, %s723_s11   ;;  %s551_s10 = sphi %s586_s10, %s722_s10   ;;  %s547_s9 = sphi %s584_s9, %s721_s9  }
   0x9   : > { %s33_s17 = sadd.s32 1, %s563_s13  ;;  %s42_s18 = sadd.s32 1, %s555_s11 }
   0xa   : > { %p35_p0 = scmp.ge.s32.totalorder %s33_s17, 2  ;;  %p49_p1 = scmp.ne.s32.totalorder %s555_s11, %s551_s10 }
   0xb   : > { %p50_p2 = scmp.eq.s32.totalorder %s567_s14, 0  ;;  %p55_p3 = scmp.ne.s32.totalorder %s551_s10, %s547_s9 }
   0xc   : > { %s727_s17 = smov (%p35_p0, %s33_s17), 0  ;;  %p56_p5 = scmp.eq.s32.totalorder %s340_s15, 0 }
   0xd   : > { %p625_p4 = por %p50_p2, %p49_p1  ;;  %s38_s20 = ssub.s32 %s563_s13, %s727_s17 }
   0xe   : > { %p107_p6 = scmp.eq.s32.totalorder %s340_s15, 1  ;;  %p40_p7 = scmp.eq.s32.totalorder %s38_s20, 0 }
   0xf   : > { %p631_p8 = por %p56_p5, %p55_p3  ;;  %p113_p10 = scmp.eq.s32.totalorder %s341_s16, 1 }
  0x10   : > { %p635_p9 = por %p107_p6, %p49_p1  ;;  %p343_p12 = scmp.ge.s32.totalorder %s567_s14, 2 }
  0x11   : > { %s640_s23 = scalar_select %p40_p7, %s555_s11, %s42_s18  }
  0x12   : > { %p642_p11 = por %p113_p10, %p55_p3  ;;  %p370_p13 = scmp.lt.s32.totalorder %s567_s14, 2 }
  0x13   : > { %s133_s25 = sand.u32 1, %s555_s11   ;;  %s345_s27 = sshll.u32 %s563_s13, 1 }
  0x14   : > { %s344_s26 = sshll.u32 %s133_s25, 1  ;;  %s143_s30 = scalar_lea.hbm %s714_s0, %s345_s27 }
  0x15   : > { %s137_s3 = scalar_lea.vmem [#allocation2], %s344_s26  ;;  %s145_s5 = sshll.u32 %s143_s30, 4  ;;  %s146_s5 = int_to_ptr.hbm [resolvable:$true] %s145_s5 }
  0x16   : > { %s147_s4 = sshll.u32 %s137_s3, 4  ;;  %p360_p0 = pnand %p370_p13, %p625_p4  ;;  %s148_s4 = int_to_ptr.vmem [resolvable:$true] %s147_s4 }
  0x17   : > { %p346_p1 = scmp.ge.s32.totalorder %s567_s14, 1  ;;  %p169_p2 = scmp.lt.s32.totalorder %s567_s14, 3 }
  0x18   : > { %s134_s6 = scalar_lea.sflag [#allocation3], %s133_s25  ;;  %s160_s15 = scalar_lea.hbm %s715_s1, %s563_s13 }
  0x19   : > { %362 = dma.hbm_to_vmem [thread:$0]  (!%p360_p0), %s146_s5, 32, %s148_s4, %s134_s6  }
  0x1a   : > { %p170_p3 = pnand %p346_p1, %p169_p2  ;;  %s157_s16 = scalar_lea.vmem [#allocation5], %s133_s25 }
  0x1b   : > { %s164_s18 = sshll.u32 %s157_s16, 4  ;;  %s162_s20 = sshll.u32 %s160_s15, 4  ;;  %s165_s18 = int_to_ptr.vmem [resolvable:$true] %s164_s18  ;;  %s163_s20 = int_to_ptr.hbm [resolvable:$true] %s162_s20 }
  0x1c   : > { %s155_s26 = scalar_lea.sflag [#allocation6], %s133_s25  ;;  %173 = sbr.rel (%p170_p3) target bundleno = 51 (0x33), region = 28 }
  0x1d   : > { %365 = dma.hbm_to_vmem [thread:$0]  (!%p360_p0), %s163_s20, 16, %s165_s18, %s155_s26  }
  0x1e   : > { %s662_s19 = sand.u32 (!%p170_p3), 1, %s551_s10  }
  0x1f   : > { %s347_s27 = sshll.u32 (!%p170_p3), %s662_s19, 1  ;;  %s176_s28 = scalar_lea.sflag (!%p170_p3), [#allocation3], %s662_s19 }
  0x20   : > { %s179_s29 = scalar_lea.vmem (!%p170_p3), [#allocation2], %s347_s27 }
  0x21   : > { %534 = dma.done.wait (%p631_p8), %s176_s28, 32  }
  0x22   : > { %536 = vsyncadd (%p631_p8), %s176_s28, 4294967264  ;;  %s186_s25 = scalar_lea.sflag [#allocation6], %s662_s19  ;;  %s188_s30 = scalar_lea.vmem [#allocation5], %s662_s19 }
  0x23   : > { %538 = dma.done.wait (%p631_p8), %s186_s25, 16  }
  0x24   : > { %540 = vsyncadd (%p631_p8), %s186_s25, 4294967280  ;;  %s350_s3 = sshll.u32 %s559_s12, 1  ;;  %s213_s7 = scalar_lea.vmem [#allocation7], %s347_s27  ;;  %v214_v0 = vld [vmem:[%s179_s29] sm:$0x3] }
  0x25   : > { %s234_s6 = scalar_lea.hbm %s716_s2, %s350_s3  ;;  %s236_s8 = sshll.u32 %s213_s7, 4  ;;  %v420_v1 = vld [vmem:[%s188_s30] ss:$0 sm:$0xff]  ;;  %s237_s8 = int_to_ptr.vmem [resolvable:$true] %s236_s8 }
  0x26   : > { %s238_s15 = sshll.u32 %s234_s6, 4  ;;  %v219_v2 = vadd.f32 %v420_v1, %v214_v0  ;;  %s222_s16 = scalar_lea.sflag [#allocation4], %s662_s19  ;;  %s239_s15 = int_to_ptr.hbm [resolvable:$true] %s238_s15 }
  0x27   : > { %s495_s21 = sshra.s32 %s239_s15, 4  ;;  %s501_s26 = scalar_lea.hbm %s716_s2, 4  ;;  %s496_s21 = int_to_ptr.hbm [resolvable:$true] %s495_s21 }
  0x28   : > { %220 = vst [vmem:[%s213_s7] sm:$0x3] %v219_v2  ;;  %s497_s18 = scalar_lea.hbm %s496_s21, 2  ;;  %p502_p7 = scmp.lt.s32.totalorder %s496_s21, %s716_s2 }
  0x29   : > { %p498_p4 = scmp.ne.s32.totalorder %s496_s21, %s497_s18  ;;  %p503_p8 = scmp.lt.s32.totalorder %s501_s26, %s497_s18 }
  0x2b   : > { %p499_p5 = pnand %p498_p4, %p635_p9  ;;  %p504_p10 = por %p503_p8, %p502_p7 }
  0x2d   : > { %p500_p6 = pneg %p499_p5 }
  0x2f   : > { %p505_p13 = pnand %p504_p10, %p500_p6 }
  0x31   : > { %508 = shalt.err (!%p505_p13)
}
  0x32   : > { %357 = dma.vmem_to_hbm [thread:$0]  (%p635_p9), %s237_s8, 32, %s239_s15, %s222_s16  }
  0x33 PF: > { %s250_s19 = sand.u32 1, %s547_s9   ;;  %p367_p0 = pnand %p343_p12, %p642_p11 }
  0x34   : > { %s251_s29 = scalar_lea.sflag [#allocation4], %s250_s19 }
  0x35   : > { %p368_p1 = pneg %p367_p0 }
  0x37   : > { %542 = dma.done.wait (%p368_p1), %s251_s29, 32  }
  0x38   : > { %544 = vsyncadd (%p368_p1), %s251_s29, 4294967264  ;;  %s21_s14 = sadd.s32 1, %s567_s14   ;;  %s721_s9 = smov %s551_s10 }
  0x39   : > { %p18_p2 = scmp.ge.s32.totalorder %s21_s14, 4   ;;  %s722_s10 = smov %s555_s11 }
  0x3a   : > { %s723_s11 = smov %s640_s23  ;;  %s724_s12 = smov %s563_s13 }
  0x3b   : > { %s725_s13 = smov %s727_s17  ;;  %20 = sbr.rel (!%p18_p2) target bundleno = 8 (0x8), region = 86 }
  0x40   :  { %257 = vsyncpa [#allocation3], 1 }
  0x41   :  { %259 = vsyncpa [#allocation3 + $0x1], 1 }
  0x42   :  { %260 = vsyncpa [#allocation6], 1 }
  0x43   :  { %262 = vsyncpa [#allocation6 + $0x1], 1 }
  0x44   :  { %263 = vsyncpa [#allocation4], 1 }
  0x45   :  { %265 = vsyncpa [#allocation4 + $0x1], 1 }

</bundles_post_ra>
